<compile_context>
chip_gen: v6e
topology: v6e:2x2x1
jax: 0.10.0
libtpu: 0.0.40
codegen_flags: <defaults>
</compile_context>

<pallas_src>
import jax
import jax.numpy as jnp
from jax import lax
from jax.experimental import pallas as pl
from jax.experimental.pallas import tpu as pltpu


def _sublane_multiple(dtype) -> int:
    itemsize = jnp.dtype(dtype).itemsize
    return {4: 8, 2: 16, 1: 32}.get(itemsize, 8)


def _choose_tile_q(num_patches, batch, dtype, target=4096):
    """Pick the per-step patch-row tile.

    Prefers a dtype-aligned divisor of num_patches (no tail tile, no padding),
    capped so the grid has at least two steps when possible (v7x: 2 TCs share
    the 'parallel' axes) and so double-buffered tiles stay small in VMEM.
    """
    sub = _sublane_multiple(dtype)
    if batch >= 2 or num_patches < 2 * sub:
        cap = num_patches
    else:
        cap = num_patches // 2          # guarantee >= 2 grid steps when B == 1
    cap = min(cap, target)
    if num_patches <= cap:
        return num_patches              # one full tile; full-dim block is exempt
                                        # from the sublane-multiple rule
    d = (cap // sub) * sub
    while d >= sub:
        if num_patches % d == 0:
            return d                    # exact divisor: no partial tail tile
        d -= sub
    return max(sub, (cap // sub) * sub)  # partial tail tile (masked by Pallas)


def _embed_matmul_kernel(xp_ref, w_ref, b_ref, o_ref):
    # xp_ref: (1, tq, K) patch rows; w_ref: (K, E) VMEM-resident weights;
    # b_ref: (1, E) bias; o_ref: (1, tq, E) final output tile.
    # MXU matmul with f32 accumulation, bias add, store.
    acc = jnp.dot(xp_ref[0], w_ref[...], preferred_element_type=jnp.float32)
    o_ref[0] = (acc + b_ref[...]).astype(o_ref.dtype)


def patch_embed_forward(x, weight, bias, patch_size, *, tile_q=4096):
    """Forward pass of Embed.

    Args:
      x:       (B, C, H, W) float32, NCHW (PyTorch convention).
      weight:  (E, C, ph, pw) float32, PyTorch Conv2d weight layout.
      bias:    (E,) float32.
      patch_size: int, kernel == stride of the conv.
      tile_q:  target patch rows per grid step.

    Returns:
      (B, num_patches, E) float32.
    """
    B, C, H, W = x.shape
    E = weight.shape[0]
    p = patch_size
    assert H % p == 0 and W % p == 0
    HP, WP = H // p, W // p
    num_patches = HP * WP
    K = C * p * p

    # --- glue: extract non-overlapping patches, flattened in (c, di, dj)
    # order to match PyTorch Conv2d weight flattening.
    xp = x.reshape(B, C, HP, p, WP, p)
    xp = jnp.transpose(xp, (0, 2, 4, 1, 3, 5))
    xp = xp.reshape(B, num_patches, K)

    w2d = weight.reshape(E, K).T            # (K, E), conv reduction order
    b2d = bias.reshape(1, E)

    tq = _choose_tile_q(num_patches, B, x.dtype, target=tile_q)
    grid = (B, pl.cdiv(num_patches, tq))

    # VMEM budget: double-buffered input/output tiles + resident weight/bias,
    # with slack; clamped so we never over-request scoped VMEM.
    itemsize = jnp.dtype(x.dtype).itemsize
    tile_bytes = 2 * tq * (K + E) * itemsize + (K + 1) * E * 4
    vmem_limit = int(min(max(2 * tile_bytes + (4 << 20), 8 << 20), 64 << 20))

    out = pl.pallas_call(
        _embed_matmul_kernel,
        out_shape=jax.ShapeDtypeStruct((B, num_patches, E), x.dtype),
        grid_spec=pl.GridSpec(
            grid=grid,
            in_specs=[
                pl.BlockSpec((1, tq, K), lambda b, i: (b, i, 0)),  # patch rows
                pl.BlockSpec((K, E), lambda b, i: (0, 0)),         # weights: resident
                pl.BlockSpec((1, E), lambda b, i: (0, 0)),         # bias:    resident
            ],
            out_specs=pl.BlockSpec((1, tq, E), lambda b, i: (b, i, 0)),
        ),
        compiler_params=pltpu.CompilerParams(
            dimension_semantics=("parallel", "parallel"),  # shard tiles over TCs (v7x)
            vmem_limit_bytes=vmem_limit,
            allow_input_fusion=[True, False, False],
        ),
    )(xp, w2d, b2d)
    # Output is already (B, num_patches, E): no de-pad slice, no reshape.
    return out


def reference_forward(x, weight, bias, patch_size):
    """Pure-JAX reference using a real strided conv (matches PyTorch Conv2d)."""
    p = patch_size
    y = lax.conv_general_dilated(
        x, weight, window_strides=(p, p), padding="VALID",
        dimension_numbers=("NCHW", "OIHW", "NCHW"))
    y = y + bias.reshape(1, -1, 1, 1)
    B, E, HP, WP = y.shape
    return jnp.transpose(y.reshape(B, E, HP * WP), (0, 2, 1))


if __name__ == "__main__":
    # Small, forward-consistent shapes: img_size=16, patch_size=4,
    # in_chans=3, embed_dim=32, batch=2.
    B, C, H, W = 2, 3, 16, 16
    E, P = 32, 4

    key = jax.random.PRNGKey(0)
    kx, kw, kb = jax.random.split(key, 3)
    x = jax.random.normal(kx, (B, C, H, W), dtype=jnp.float32)
    # Deterministic parameter init (synthetic; not loaded from a checkpoint).
    weight = jax.random.normal(kw, (E, C, P, P), dtype=jnp.float32) * 0.02
    bias = jax.random.normal(kb, (E,), dtype=jnp.float32) * 0.02

    out = jax.block_until_ready(patch_embed_forward(x, weight, bias, P))
    ref = jax.block_until_ready(reference_forward(x, weight, bias, P))

    assert out.shape == (B, (H // P) * (W // P), E), out.shape
    assert jnp.allclose(out, ref, atol=1e-4, rtol=1e-4), float(
        jnp.max(jnp.abs(out - ref)))

    print("KERNEL_OK")
</pallas_src>

<mosaic_0001>
module attributes {stable_mosaic.version = 11 : i64} {
  func.func @_embed_matmul_kernel(%arg0: i32, %arg1: i32, %arg2: memref<1x16x48xf32, #tpu.memory_space<vmem>>, %arg3: memref<48x32xf32, #tpu.memory_space<vmem>>, %arg4: memref<1x32xf32, #tpu.memory_space<vmem>>, %arg5: memref<1x16x32xf32, #tpu.memory_space<vmem>>) attributes {dimension_semantics = [#tpu.dimension_semantics<parallel>, #tpu.dimension_semantics<parallel>], iteration_bounds = array<i64: 2, 1>, scalar_prefetch = 0 : i64, scratch_operands = 0 : i64, tpu.core_type = #tpu.core_type<tc>, window_params = [{transform_indices = @transform_0, window_bounds = array<i64: 1, 16, 48>}, {pipeline_mode = #tpu.pipeline_mode<synchronous>, transform_indices = @transform_1, window_bounds = array<i64: 48, 32>}, {pipeline_mode = #tpu.pipeline_mode<synchronous>, transform_indices = @transform_2, window_bounds = array<i64: 1, 32>}, {transform_indices = @transform_3, window_bounds = array<i64: 1, 16, 32>}]} {
    %c0 = arith.constant 0 : index
    %c0_0 = arith.constant 0 : index
    %c0_1 = arith.constant 0 : index
    %0 = vector.load %arg2[%c0, %c0_0, %c0_1] : memref<1x16x48xf32, #tpu.memory_space<vmem>>, vector<1x16x48xf32>
    %1 = vector.shape_cast %0 : vector<1x16x48xf32> to vector<16x48xf32>
    %c0_2 = arith.constant 0 : index
    %c0_3 = arith.constant 0 : index
    %2 = vector.load %arg3[%c0_2, %c0_3] : memref<48x32xf32, #tpu.memory_space<vmem>>, vector<48x32xf32>
    %cst = arith.constant dense<0.000000e+00> : vector<16x32xf32>
    %3 = tpu.matmul %1, %2, %cst {dimension_numbers = #tpu.dot_dimension_numbers<[1], [0], [0], [1], [0, 0, 1, 1], [], []>} : vector<16x48xf32>, vector<48x32xf32>, vector<16x32xf32> -> vector<16x32xf32>
    %c0_4 = arith.constant 0 : index
    %c0_5 = arith.constant 0 : index
    %4 = vector.load %arg4[%c0_4, %c0_5] : memref<1x32xf32, #tpu.memory_space<vmem>>, vector<1x32xf32>
    %5 = vector.broadcast %4 : vector<1x32xf32> to vector<16x32xf32>
    %6 = arith.addf %3, %5 : vector<16x32xf32>
    %c0_6 = arith.constant 0 : index
    %c0_7 = arith.constant 0 : index
    %c0_8 = arith.constant 0 : index
    %7 = vector.load %arg5[%c0_6, %c0_7, %c0_8] : memref<1x16x32xf32, #tpu.memory_space<vmem>>, vector<1x16x32xf32>
    %8 = vector.shape_cast %7 : vector<1x16x32xf32> to vector<16x32xf32>
    %9 = vector.shape_cast %6 : vector<16x32xf32> to vector<1x16x32xf32>
    tpu.vector_store %arg5[%c0_6, %c0_7, %c0_8], %9 {strides = array<i32>} : memref<1x16x32xf32, #tpu.memory_space<vmem>>, vector<1x16x32xf32>,
    return
  }
  func.func @transform_0(%arg0: i32, %arg1: i32) -> (i32, i32, i32) {
    %c0_i32 = arith.constant 0 : i32
    %c0_i32_0 = arith.constant 0 : i32
    return %arg0, %arg1, %c0_i32 : i32, i32, i32
  }
  func.func @transform_1(%arg0: i32, %arg1: i32) -> (i32, i32) {
    %c0_i32 = arith.constant 0 : i32
    %c0_i32_0 = arith.constant 0 : i32
    %c0_i32_1 = arith.constant 0 : i32
    return %c0_i32, %c0_i32_0 : i32, i32
  }
  func.func @transform_2(%arg0: i32, %arg1: i32) -> (i32, i32) {
    %c0_i32 = arith.constant 0 : i32
    %c0_i32_0 = arith.constant 0 : i32
    %c0_i32_1 = arith.constant 0 : i32
    return %c0_i32, %c0_i32_0 : i32, i32
  }
  func.func @transform_3(%arg0: i32, %arg1: i32) -> (i32, i32, i32) {
    %c0_i32 = arith.constant 0 : i32
    %c0_i32_0 = arith.constant 0 : i32
    return %arg0, %arg1, %c0_i32 : i32, i32, i32
  }
}

</mosaic_0001>

<bundles_post_ra>
// kernel: tpu_custom_call.1
= control target key start
LH: loop header
LB: loop body
LE: loop exit
PB: predicated region body
PF: predicated region fallthrough
CT: control target
= control target key end

     0   :  { %8 = vsyncpa [#allocation3], 0  ;;  %s729_s0 = inlined_call_operand.vmem [shape: f32[2,16,48], index: 0, kind: input, shape index: {}]   ;;  %s730_s1 = inlined_call_operand.vmem [shape: f32[48,32], index: 1, kind: input, shape index: {}]   ;;  %s731_s2 = inlined_call_operand.vmem [shape: f32[1,32], index: 2, kind: input, shape index: {}]   ;;  %s732_s3 = inlined_call_operand.hbm [shape: f32[2,16,32], index: 3, kind: output, shape index: {}]  }
   0x1   :  { %10 = vsyncpa [#allocation3 + $0x1], 0  ;;  %s594_s12 = smov 0   ;;  %s596_s13 = smov 0  }
   0x2   :  { %s598_s14 = smov 0   ;;  %s600_s15 = smov 0  }
   0x3   :  { %s602_s16 = smov 0   ;;  %s604_s17 = smov 0  }
   0x4 LB: > { %s395_s18 = sadd.s32 4294967295, %s569_s17   ;;  %s396_s19 = sadd.s32 4294967294, %s569_s17   ;;  %s569_s17 = sphi %s604_s17, %s16_s17   ;;  %s565_s16 = sphi %s602_s16, %s739_s16   ;;  %s561_s15 = sphi %s600_s15, %s738_s15   ;;  %s557_s14 = sphi %s598_s14, %s737_s14   ;;  %s553_s13 = sphi %s596_s13, %s736_s13   ;;  %s549_s12 = sphi %s594_s12, %s735_s12  }
   0x5   : > { %s28_s20 = sadd.s32 1, %s565_s16  ;;  %s107_s21 = sadd.s32 1, %s557_s14 }
   0x6   : > { %p30_p0 = scmp.ge.s32.totalorder %s28_s20, 2  ;;  %p117_p1 = scmp.ne.s32.totalorder %s557_s14, %s553_s13 }
   0x7   : > { %p118_p2 = scmp.eq.s32.totalorder %s395_s18, 1  ;;  %p123_p3 = scmp.ne.s32.totalorder %s553_s13, %s549_s12 }
   0x8   : > { %s741_s20 = smov (%p30_p0, %s28_s20), 0  ;;  %p124_p5 = scmp.eq.s32.totalorder %s396_s19, 1 }
   0x9   : > { %p634_p4 = por %p118_p2, %p117_p1  ;;  %s102_s23 = ssub.s32 %s565_s16, %s741_s20 }
   0xa   : > { %p399_p6 = scmp.ge.s32.totalorder %s569_s17, 1  ;;  %p105_p7 = scmp.eq.s32.totalorder %s102_s23, 0 }
   0xb   : > { %p641_p8 = por %p124_p5, %p123_p3  ;;  %p161_p9 = scmp.lt.s32.totalorder %s569_s17, 3 }
   0xc   : > { %s647_s25 = scalar_select %p105_p7, %s557_s14, %s107_s21  }
   0xd   : > { %p162_p10 = pnand %p399_p6, %p161_p9 }
   0xe   : > { %p190_p11 = scmp.lt.s32.totalorder (!%p162_p10), %s561_s15, 1  ;;  %s186_s26 = sand.u32 (!%p162_p10), 1, %s553_s13  }
   0xf   : > { %165 = sbr.rel (%p162_p10) target bundleno = 244 (0xf4), region = 32  ;;  %s400_s27 = sshll.u32 (!%p162_p10), %s186_s26, 4 }
  0x10   : > { %s188_s30 = scalar_lea.vmem (!%p162_p10), [#allocation2], %s400_s27  ;;  %s684_s9 = scalar_lea.sflag (!%p162_p10), [#allocation3], %s186_s26 }
  0x11   : > { %s316_s4 = sshll.u32 (!%p162_p10), %s188_s30, 4  ;;  %s571_s10 = smov (!%p162_p10), [#allocation2]   ;;  %s677_s4 = int_to_ptr.vmem [resolvable:$true] %s316_s4 }
  0x14   : > { %v207_v0 = vld [vmem:[%s730_s1 + $0x28] sm:$0xff]  ;;  %v206_v1 = vld [vmem:[%s730_s1 + $0x20] sm:$0xff]  ;;  %v205_v2 = vld [vmem:[%s730_s1 + $0x18] sm:$0xff]  ;;  %s191_s5 = scalar_select %p190_p11, %s561_s15, 1  ;;  %vm215_vm0 = vcmask 392192   ;;  %vm297_vm1 = vcmask 261120  }
  0x15   : > { %421 = vmatprep.subr.mxu0 %v207_v0  ;;  %v204_v3 = vld [vmem:[%s730_s1 + $0x10] sm:$0xff]  ;;  %v203_v4 = vld [vmem:[%s730_s1 + $0x8] sm:$0xff]  ;;  %v202_v6 = vld [vmem:[%s730_s1] sm:$0xff] }
  0x16   : > { %422 = vmatpush3.msra.mxu0 %v207_v0  ;;  %s411_s8 = sshll.u32 %s191_s5, 4  ;;  %v403_v8 = vld [vmem:[%s731_s2] ss:$0 sm:$0xff]  ;;  %s412_s5 = sshll.u32 %s561_s15, 8 }
  0x17   : > { %423 = vmatprep.subr.mxu0 %v206_v1  ;;  %s197_s11 = scalar_lea.vmem %s729_s0, %s411_s8  ;;  %s682_s8 = scalar_lea.hbm %s732_s3, %s412_s5 }
  0x18   : > { %424 = vmatpush3.msra.mxu0 %v206_v1  ;;  %v200_v5 = vld [vmem:[%s197_s11] sm:$0xff]  ;;  %v201_v7 = vld [vmem:[%s197_s11 + $0x8] sm:$0xff]  ;;  %s493_s15 = scalar_lea.vmem %s677_s4, 256  ;;  %s497_s11 = sshll.u32 %s571_s10, 4  ;;  %s498_s11 = int_to_ptr.vmem [resolvable:$false] %s497_s11 }
  0x19   : > { %425 = vmatprep.subr.mxu0 %v205_v2  ;;  %433 = vmatprep.mubr.msk.f32.mxu0 %vm215_vm0, %v200_v5  ;;  %p494_p12 = scmp.ne.s32.totalorder %s677_s4, %s493_s15  ;;  %s499_s18 = scalar_lea.vmem %s498_s11, 512 }
  0x1a   : > { %426 = vmatpush3.msra.mxu0 %v205_v2  ;;  %p500_p1 = scmp.lt.s32.totalorder %s677_s4, %s498_s11  ;;  %p501_p2 = scmp.lt.s32.totalorder %s499_s18, %s493_s15 }
  0x1b   : > { %427 = vmatprep.subr.mxu0 %v204_v3  ;;  %p495_p13 = pnand %p494_p12, %p634_p4 }
  0x1c   : > { %428 = vmatpush3.msra.mxu0 %v204_v3  ;;  %p502_p3 = por %p501_p2, %p500_p1 }
  0x1d   : > { %429 = vmatprep.subr.mxu0 %v203_v4  ;;  %p496_p0 = pneg %p495_p13 }
  0x1e   : > { %430 = vmatpush3.msra.mxu0 %v203_v4 }
  0x1f   : > { %431 = vmatprep.subr.mxu0 %v202_v6  ;;  %p503_p5 = pnand %p502_p3, %p496_p0 }
  0x20   : > { %432 = vmatpush3.msra.mxu0 %v202_v6 }
  0x21   : > { %434 = vmatmul.mubr.msk.f32.vlgmr.msra.gmra.mxu0 %vm215_vm0, %v201_v7 }
  0xe1   : > { %v435_v9 = vpop.f32.mrf.mxu0 }
  0xe2   : > { %v294_v10 = vadd.f32 %v435_v9, %v403_v8 }
  0xe3   : > { %v288_v11 = vpop.f32.mrf.mxu0 }
  0xe4   : > { %299 = vst.msk [vmem:[%s188_s30 + $0x8] sm:$0xff] %vm297_vm1, %v294_v10  ;;  %v289_v12 = vadd.f32 %v403_v8, %v288_v11 }
  0xe6   : > { %298 = vst.msk [vmem:[%s188_s30] sm:$0xff] %vm297_vm1, %v289_v12 }
  0xe7   : > { %506 = shalt.err (!%p503_p5)
}
  0xe8   : > { %s507_s19 = scalar_lea.hbm %s682_s8, 256  ;;  %s511_s26 = scalar_lea.hbm %s732_s3, 512 }
  0xe9   : > { %p508_p6 = scmp.ne.s32.totalorder %s682_s8, %s507_s19  ;;  %p512_p10 = scmp.lt.s32.totalorder %s682_s8, %s732_s3 }
  0xea   : > { %p513_p11 = scmp.lt.s32.totalorder %s511_s26, %s507_s19 }
  0xeb   : > { %p509_p7 = pnand %p508_p6, %p634_p4 }
  0xec   : > { %p514_p12 = por %p513_p11, %p512_p10 }
  0xed   : > { %p510_p9 = pneg %p509_p7 }
  0xef   : > { %p515_p13 = pnand %p514_p12, %p510_p9 }
  0xf1   : > { %518 = shalt.err (!%p515_p13)
}
  0xf2   : > { %s572_s29 = smov 128   ;;  %s573_s30 = smov 8  }
  0xf3   : > { %436 = dma.vmem_to_hbm [thread:$0]  (%p634_p4), %s677_s4, 256, %s682_s8, %s684_s9, %s572_s29, %s572_s29, %s573_s30  }
  0xf4 PF: > { %p442_p0 = scmp.ge.s32.totalorder %s569_s17, 2  ;;  %s331_s5 = sand.u32 1, %s549_s12  }
  0xf5   : > { %s332_s6 = scalar_lea.sflag [#allocation3], %s331_s5 }
  0xf6   : > { %p439_p1 = pnand %p442_p0, %p641_p8 }
  0xf8   : > { %p440_p2 = pneg %p439_p1 }
  0xfa   : > { %544 = dma.done.wait (%p440_p2), %s332_s6, 256  }
  0xfb   : > { %546 = vsyncadd (%p440_p2), %s332_s6, 4294967040  ;;  %s16_s17 = sadd.s32 1, %s569_s17   ;;  %s735_s12 = smov %s553_s13 }
  0xfc   : > { %p13_p3 = scmp.ge.s32.totalorder %s16_s17, 4   ;;  %s736_s13 = smov %s557_s14 }
  0xfd   : > { %s737_s14 = smov %s647_s25  ;;  %s738_s15 = smov %s565_s16 }
  0xfe   : > { %s739_s16 = smov %s741_s20  ;;  %15 = sbr.rel (!%p13_p3) target bundleno = 4 (0x4), region = 67 }
 0x103   :  { %337 = vsyncpa [#allocation3], 1 }
 0x104   :  { %339 = vsyncpa [#allocation3 + $0x1], 1 }

</bundles_post_ra>
